<compile_context>
chip_gen: v7x
topology: tpu7x:2x2x1
jax: 0.10.0
libtpu: 0.0.40
codegen_flags: <defaults>
</compile_context>

<pallas_src>
import jax
import jax.numpy as jnp
from jax.experimental import pallas as pl
from jax.experimental.pallas import tpu as pltpu

LANE = 128
MAX_TILE_B = 512


def _round_up(n, m):
    return ((n + m - 1) // m) * m


def _cdiv(a, b):
    return -(-a // b)


def _pad2(a, rows, cols):
    r, c = a.shape
    if r == rows and c == cols:
        return a
    return jnp.pad(a, ((0, rows - r), (0, cols - c)))


def _chip_info():
    """Returns (physical VMEM bytes per core, #TensorCores per chip, MXU M granularity)."""
    vmem_bytes = 64 << 20          # conservative default == v7x per-TC VMEM
    num_tc = 1
    mxu_m = 256                    # v6e / v7x MXU M granularity
    try:
        vmem_bytes = int(pltpu.get_tpu_info().vmem_capacity_bytes)
    except Exception:
        pass
    try:
        kind = jax.devices()[0].device_kind.lower()
        if "v7" in kind:
            num_tc = 2             # two TensorCores per chip
        if "v5" in kind:
            mxu_m = 128            # v5e MXU is 128-wide
    except Exception:
        pass
    return vmem_bytes, num_tc, mxu_m


def sae_kernel(x_ref,
               w1_ref, b1_ref,   # encoder.0: Linear(input_dim -> 2*enc)
               w2_ref, b2_ref,   # encoder.2: Linear(2*enc -> enc)
               w3_ref, b3_ref,   # decoder.0: Linear(enc -> 2*enc)
               w4_ref, b4_ref,   # decoder.2: Linear(2*enc -> input_dim)
               dec_ref, enc_ref):
    # Matmul operands use the stored weight dtype (f32 or bf16); accumulation
    # and all elementwise math (bias add, ReLU, sigmoid) stay in f32.
    x = x_ref[...].astype(w1_ref.dtype)

    # ----- encoder -----
    h1 = jnp.dot(x, w1_ref[...], preferred_element_type=jnp.float32) + b1_ref[...]
    h1 = jnp.maximum(h1, 0.0)                                        # ReLU (f32)
    z = jnp.dot(h1.astype(w2_ref.dtype), w2_ref[...],
                preferred_element_type=jnp.float32) + b2_ref[...]
    enc = jax.nn.sigmoid(z)                                          # Sigmoid (f32)

    # ----- decoder -----
    h2 = jnp.dot(enc.astype(w3_ref.dtype), w3_ref[...],
                 preferred_element_type=jnp.float32) + b3_ref[...]
    h2 = jnp.maximum(h2, 0.0)                                        # ReLU (f32)
    dec = jnp.dot(h2.astype(w4_ref.dtype), w4_ref[...],
                  preferred_element_type=jnp.float32) + b4_ref[...]

    enc_ref[...] = enc.astype(enc_ref.dtype)
    dec_ref[...] = dec.astype(dec_ref.dtype)


def sparse_autoencoder_forward(x, params, *, tile_b=None):
    """Fused SAE forward. Returns (decoded, encoded) at the original shapes."""
    w1, b1, w2, b2, w3, b3, w4, b4 = params
    B, input_dim = x.shape
    hidden_dim = w1.shape[1]          # 2 * encoding_dim
    encoding_dim = w2.shape[1]

    act_itemsize = jnp.dtype(x.dtype).itemsize
    sublane = 8 * (4 // act_itemsize)           # 8 for f32, 16 for bf16

    vmem_phys, num_tc, mxu_m = _chip_info()
    vmem_cap = int(vmem_phys * 0.8)             # ~20% headroom for compiler scratch

    # --- lane-axis (last-dim) padding to multiples of 128 ---
    Dp = _round_up(input_dim, LANE)
    Hp = _round_up(hidden_dim, LANE)
    Ep = _round_up(encoding_dim, LANE)

    # --- balanced batch tiling -----------------------------------------------
    if tile_b is None:
        n_steps = _cdiv(B, MAX_TILE_B)
        if num_tc > 1 and B >= 2 * num_tc * sublane:
            # v7x: even #steps >= 4 so each core runs >=2 steps (pipelining).
            n_steps = _round_up(max(n_steps, 2 * num_tc), num_tc)
        tile_b = _round_up(_cdiv(B, n_steps), sublane)
        # Round M up to the MXU granularity only when the extra padding is small.
        if tile_b > mxu_m:
            cand = _round_up(tile_b, mxu_m)
            if n_steps * cand - B <= max(n_steps * sublane, B // 16):
                tile_b = cand
    else:
        tile_b = max(sublane, _round_up(tile_b, sublane))

    # --- VMEM footprint model -------------------------------------------------
    # weights (x1, single-buffered) + double-buffered x/out tiles + f32
    # intermediates + the .astype cast copies the kernel materializes.
    def footprint(tb, w_itemsize, weight_bytes):
        io_bytes = 2 * tb * (2 * Dp + Ep) * act_itemsize                  # dbl-buffered x, dec, enc
        f32_tmp = 4 * tb * (2 * Hp + Ep + Dp)                             # h1, z/enc, h2, dec (f32)
        cast_tmp = (tb * (2 * Hp + Ep) * w_itemsize                       # h1/enc/h2 -> matmul dtype
                    + tb * (Dp + Ep) * act_itemsize)                      # dec/enc -> output dtype
        return weight_bytes + io_bytes + f32_tmp + cast_tmp

    w_dtype = w1.dtype
    weight_only = (Dp * Hp + Hp * Ep + Ep * Hp + Hp * Dp) * jnp.dtype(w_dtype).itemsize
    bias_bytes = (2 * Hp + Ep + Dp) * 4                                   # biases stay f32
    weight_bytes = weight_only + bias_bytes

    # v7x fallback: if even the smallest tile with f32-resident weights cannot
    # fit the per-core VMEM budget, store weights (matmul operands) in bf16.
    if jnp.dtype(w_dtype).itemsize == 4 and footprint(sublane, 4, weight_bytes) > vmem_cap:
        w_dtype = jnp.bfloat16
        weight_bytes = weight_only // 2 + bias_bytes

    # Shrink the batch tile until the working set fits the budget.
    w_itemsize = jnp.dtype(w_dtype).itemsize
    while tile_b > sublane and footprint(tile_b, w_itemsize, weight_bytes) > vmem_cap:
        tile_b = max(sublane, _round_up(tile_b // 2, sublane))
    # TODO(synk): if even tile_b == sublane overflows (very large input_dim on
    # v7x), add a K-tiling grid axis over the hidden dim instead of keeping all
    # four weight matrices resident.

    n_steps = _cdiv(B, tile_b)
    Bp = n_steps * tile_b

    # --- pad operands (no-ops when already aligned) ---
    xp = _pad2(x, Bp, Dp)
    w1p, b1p = _pad2(w1, Dp, Hp).astype(w_dtype), _pad2(b1, 1, Hp)
    w2p, b2p = _pad2(w2, Hp, Ep).astype(w_dtype), _pad2(b2, 1, Ep)
    w3p, b3p = _pad2(w3, Ep, Hp).astype(w_dtype), _pad2(b3, 1, Hp)
    w4p, b4p = _pad2(w4, Hp, Dp).astype(w_dtype), _pad2(b4, 1, Dp)
    consts = (w1p, b1p, w2p, b2p, w3p, b3p, w4p, b4p)

    # Constant blocks (identical tile every grid step) -> single buffering.
    def const_spec(a):
        return pl.BlockSpec(a.shape, lambda i: (0, 0),
                            pipeline_mode=pl.Buffered(1))

    grid_spec = pltpu.PrefetchScalarGridSpec(
        num_scalar_prefetch=0,
        grid=(n_steps,),
        in_specs=[pl.BlockSpec((tile_b, Dp), lambda i: (i, 0))]     # x tile
                 + [const_spec(a) for a in consts],
        out_specs=[
            pl.BlockSpec((tile_b, Dp), lambda i: (i, 0)),            # decoded
            pl.BlockSpec((tile_b, Ep), lambda i: (i, 0)),            # encoded
        ],
    )

    fp_bytes = footprint(tile_b, w_itemsize, weight_bytes)
    vmem_limit = int(min(vmem_cap, max(16 << 20, fp_bytes * 3 // 2)))

    flops = 2 * Bp * (Dp * Hp + Hp * Ep + Ep * Hp + Hp * Dp)
    bytes_accessed = (xp.size * act_itemsize + weight_bytes
                      + Bp * (Dp + Ep) * act_itemsize)
    cost = pl.CostEstimate(flops=flops,
                           transcendentals=Bp * Ep,                  # sigmoid
                           bytes_accessed=bytes_accessed)

    dec_p, enc_p = pl.pallas_call(
        sae_kernel,
        grid_spec=grid_spec,
        out_shape=(
            jax.ShapeDtypeStruct((Bp, Dp), x.dtype),
            jax.ShapeDtypeStruct((Bp, Ep), x.dtype),
        ),
        compiler_params=pltpu.CompilerParams(
            dimension_semantics=("parallel",),
            vmem_limit_bytes=vmem_limit),
        cost_estimate=cost,
    )(xp, *consts)

    # Slice only when padding was actually added (avoids extra HBM round trips).
    dec_out = dec_p if (Bp == B and Dp == input_dim) else dec_p[:B, :input_dim]
    enc_out = enc_p if (Bp == B and Ep == encoding_dim) else enc_p[:B, :encoding_dim]
    return dec_out, enc_out


def init_params(key, input_dim, encoding_dim, dtype=jnp.float32):
    """PyTorch-Linear-style init. Weights stored (in, out); biases (1, out) f32."""
    hidden = 2 * encoding_dim
    dims = [
        (input_dim, hidden),     # encoder.0
        (hidden, encoding_dim),  # encoder.2
        (encoding_dim, hidden),  # decoder.0
        (hidden, input_dim),     # decoder.2
    ]
    params = []
    for fan_in, fan_out in dims:
        key, kw, kb = jax.random.split(key, 3)
        bound = 1.0 / (fan_in ** 0.5)
        w = jax.random.uniform(kw, (fan_in, fan_out), dtype, -bound, bound)
        b = jax.random.uniform(kb, (1, fan_out), jnp.float32, -bound, bound)
        params.extend([w, b])
    return tuple(params)


def reference_forward(x, params):
    """Pure-JAX f32 reference with identical semantics (sanity check)."""
    w1, b1, w2, b2, w3, b3, w4, b4 = [p.astype(jnp.float32) for p in params]
    x = x.astype(jnp.float32)
    h1 = jnp.maximum(x @ w1 + b1, 0.0)
    enc = jax.nn.sigmoid(h1 @ w2 + b2)
    h2 = jnp.maximum(enc @ w3 + b3, 0.0)
    dec = h2 @ w4 + b4
    return dec, enc


if __name__ == "__main__":
    # Small, module-consistent shapes: batch=64, input_dim=64, encoding_dim=32.
    input_dim, encoding_dim, batch = 64, 32, 64

    key = jax.random.PRNGKey(0)
    key, kx = jax.random.split(key)
    x = jax.random.normal(kx, (batch, input_dim), jnp.float32)
    params = init_params(key, input_dim, encoding_dim)

    # --- f32 operands, tight check ------------------------------------------
    decoded, encoded = sparse_autoencoder_forward(x, params)
    jax.block_until_ready((decoded, encoded))
    dec_ref, enc_ref = reference_forward(x, params)
    assert decoded.shape == (batch, input_dim)
    assert encoded.shape == (batch, encoding_dim)
    assert jnp.allclose(decoded, dec_ref, atol=1e-5, rtol=1e-5)
    assert jnp.allclose(encoded, enc_ref, atol=1e-5, rtol=1e-5)

    # --- bf16 matmul operands (recommended on v5e/v6e/v7x), f32 accumulate ---
    x16 = x.astype(jnp.bfloat16)
    params16 = tuple(p.astype(jnp.bfloat16) if i % 2 == 0 else p
                     for i, p in enumerate(params))   # weights bf16, biases f32
    dec16, enc16 = sparse_autoencoder_forward(x16, params16)
    jax.block_until_ready((dec16, enc16))
    dec_ref16, enc_ref16 = reference_forward(x16, params16)
    assert jnp.allclose(dec16.astype(jnp.float32), dec_ref16, atol=5e-2, rtol=5e-2)
    assert jnp.allclose(enc16.astype(jnp.float32), enc_ref16, atol=5e-2, rtol=5e-2)

    # --- awkward batch + explicit tile to exercise the balanced-tiling path ---
    xb = jax.random.normal(key, (96, input_dim), jnp.float32)
    decb, encb = sparse_autoencoder_forward(xb, params, tile_b=32)
    jax.block_until_ready((decb, encb))
    decb_ref, encb_ref = reference_forward(xb, params)
    assert jnp.allclose(decb, decb_ref, atol=1e-5, rtol=1e-5)
    assert jnp.allclose(encb, encb_ref, atol=1e-5, rtol=1e-5)

    print("KERNEL_OK")
</pallas_src>

<mosaic_0001>
module attributes {stable_mosaic.version = 11 : i64} {
  func.func @sae_kernel(%arg0: i32, %arg1: memref<64x128xf32, #tpu.memory_space<vmem>>, %arg2: memref<128x128xf32, #tpu.memory_space<vmem>>, %arg3: memref<1x128xf32, #tpu.memory_space<vmem>>, %arg4: memref<128x128xf32, #tpu.memory_space<vmem>>, %arg5: memref<1x128xf32, #tpu.memory_space<vmem>>, %arg6: memref<128x128xf32, #tpu.memory_space<vmem>>, %arg7: memref<1x128xf32, #tpu.memory_space<vmem>>, %arg8: memref<128x128xf32, #tpu.memory_space<vmem>>, %arg9: memref<1x128xf32, #tpu.memory_space<vmem>>, %arg10: memref<64x128xf32, #tpu.memory_space<vmem>>, %arg11: memref<64x128xf32, #tpu.memory_space<vmem>>) attributes {dimension_semantics = [#tpu.dimension_semantics<parallel>], iteration_bounds = array<i64: 1>, scalar_prefetch = 0 : i64, scratch_operands = 0 : i64, tpu.core_type = #tpu.core_type<tc>, window_params = [{transform_indices = @transform_0, window_bounds = array<i64: 64, 128>}, {pipeline_mode = #tpu.pipeline_mode<synchronous>, transform_indices = @transform_1, window_bounds = array<i64: 128, 128>}, {pipeline_mode = #tpu.pipeline_mode<synchronous>, transform_indices = @transform_2, window_bounds = array<i64: 1, 128>}, {pipeline_mode = #tpu.pipeline_mode<synchronous>, transform_indices = @transform_3, window_bounds = array<i64: 128, 128>}, {pipeline_mode = #tpu.pipeline_mode<synchronous>, transform_indices = @transform_4, window_bounds = array<i64: 1, 128>}, {pipeline_mode = #tpu.pipeline_mode<synchronous>, transform_indices = @transform_5, window_bounds = array<i64: 128, 128>}, {pipeline_mode = #tpu.pipeline_mode<synchronous>, transform_indices = @transform_6, window_bounds = array<i64: 1, 128>}, {pipeline_mode = #tpu.pipeline_mode<synchronous>, transform_indices = @transform_7, window_bounds = array<i64: 128, 128>}, {pipeline_mode = #tpu.pipeline_mode<synchronous>, transform_indices = @transform_8, window_bounds = array<i64: 1, 128>}, {transform_indices = @transform_9, window_bounds = array<i64: 64, 128>}, {transform_indices = @transform_10, window_bounds = array<i64: 64, 128>}]} {
    %c0 = arith.constant 0 : index
    %c0_0 = arith.constant 0 : index
    %0 = vector.load %arg1[%c0, %c0_0] : memref<64x128xf32, #tpu.memory_space<vmem>>, vector<64x128xf32>
    %c0_1 = arith.constant 0 : index
    %c0_2 = arith.constant 0 : index
    %1 = vector.load %arg2[%c0_1, %c0_2] : memref<128x128xf32, #tpu.memory_space<vmem>>, vector<128x128xf32>
    %cst = arith.constant dense<0.000000e+00> : vector<64x128xf32>
    %2 = tpu.matmul %0, %1, %cst {dimension_numbers = #tpu.dot_dimension_numbers<[1], [0], [0], [1], [0, 0, 1, 1], [], []>} : vector<64x128xf32>, vector<128x128xf32>, vector<64x128xf32> -> vector<64x128xf32>
    %c0_3 = arith.constant 0 : index
    %c0_4 = arith.constant 0 : index
    %3 = vector.load %arg3[%c0_3, %c0_4] : memref<1x128xf32, #tpu.memory_space<vmem>>, vector<1x128xf32>
    %4 = vector.broadcast %3 : vector<1x128xf32> to vector<64x128xf32>
    %5 = arith.addf %2, %4 : vector<64x128xf32>
    %cst_5 = arith.constant 0.000000e+00 : f32
    %6 = vector.broadcast %cst_5 : f32 to vector<64x128xf32>
    %7 = arith.maximumf %5, %6 : vector<64x128xf32>
    %c0_6 = arith.constant 0 : index
    %c0_7 = arith.constant 0 : index
    %8 = vector.load %arg4[%c0_6, %c0_7] : memref<128x128xf32, #tpu.memory_space<vmem>>, vector<128x128xf32>
    %cst_8 = arith.constant dense<0.000000e+00> : vector<64x128xf32>
    %9 = tpu.matmul %7, %8, %cst_8 {dimension_numbers = #tpu.dot_dimension_numbers<[1], [0], [0], [1], [0, 0, 1, 1], [], []>} : vector<64x128xf32>, vector<128x128xf32>, vector<64x128xf32> -> vector<64x128xf32>
    %c0_9 = arith.constant 0 : index
    %c0_10 = arith.constant 0 : index
    %10 = vector.load %arg5[%c0_9, %c0_10] : memref<1x128xf32, #tpu.memory_space<vmem>>, vector<1x128xf32>
    %11 = vector.broadcast %10 : vector<1x128xf32> to vector<64x128xf32>
    %12 = arith.addf %9, %11 : vector<64x128xf32>
    %13 = arith.negf %12 : vector<64x128xf32>
    %14 = math.exp %13 : vector<64x128xf32>
    %cst_11 = arith.constant 1.000000e+00 : f32
    %15 = vector.broadcast %cst_11 : f32 to vector<64x128xf32>
    %16 = arith.addf %15, %14 : vector<64x128xf32>
    %17 = arith.divf %15, %16 : vector<64x128xf32>
    %c0_12 = arith.constant 0 : index
    %c0_13 = arith.constant 0 : index
    %18 = vector.load %arg6[%c0_12, %c0_13] : memref<128x128xf32, #tpu.memory_space<vmem>>, vector<128x128xf32>
    %cst_14 = arith.constant dense<0.000000e+00> : vector<64x128xf32>
    %19 = tpu.matmul %17, %18, %cst_14 {dimension_numbers = #tpu.dot_dimension_numbers<[1], [0], [0], [1], [0, 0, 1, 1], [], []>} : vector<64x128xf32>, vector<128x128xf32>, vector<64x128xf32> -> vector<64x128xf32>
    %c0_15 = arith.constant 0 : index
    %c0_16 = arith.constant 0 : index
    %20 = vector.load %arg7[%c0_15, %c0_16] : memref<1x128xf32, #tpu.memory_space<vmem>>, vector<1x128xf32>
    %21 = vector.broadcast %20 : vector<1x128xf32> to vector<64x128xf32>
    %22 = arith.addf %19, %21 : vector<64x128xf32>
    %cst_17 = arith.constant 0.000000e+00 : f32
    %23 = vector.broadcast %cst_17 : f32 to vector<64x128xf32>
    %24 = arith.maximumf %22, %23 : vector<64x128xf32>
    %c0_18 = arith.constant 0 : index
    %c0_19 = arith.constant 0 : index
    %25 = vector.load %arg8[%c0_18, %c0_19] : memref<128x128xf32, #tpu.memory_space<vmem>>, vector<128x128xf32>
    %cst_20 = arith.constant dense<0.000000e+00> : vector<64x128xf32>
    %26 = tpu.matmul %24, %25, %cst_20 {dimension_numbers = #tpu.dot_dimension_numbers<[1], [0], [0], [1], [0, 0, 1, 1], [], []>} : vector<64x128xf32>, vector<128x128xf32>, vector<64x128xf32> -> vector<64x128xf32>
    %c0_21 = arith.constant 0 : index
    %c0_22 = arith.constant 0 : index
    %27 = vector.load %arg9[%c0_21, %c0_22] : memref<1x128xf32, #tpu.memory_space<vmem>>, vector<1x128xf32>
    %28 = vector.broadcast %27 : vector<1x128xf32> to vector<64x128xf32>
    %29 = arith.addf %26, %28 : vector<64x128xf32>
    %c0_23 = arith.constant 0 : index
    %c0_24 = arith.constant 0 : index
    %30 = vector.load %arg11[%c0_23, %c0_24] : memref<64x128xf32, #tpu.memory_space<vmem>>, vector<64x128xf32>
    tpu.vector_store %arg11[%c0_23, %c0_24], %17 {strides = array<i32>} : memref<64x128xf32, #tpu.memory_space<vmem>>, vector<64x128xf32>,
    %c0_25 = arith.constant 0 : index
    %c0_26 = arith.constant 0 : index
    %31 = vector.load %arg10[%c0_25, %c0_26] : memref<64x128xf32, #tpu.memory_space<vmem>>, vector<64x128xf32>
    tpu.vector_store %arg10[%c0_25, %c0_26], %29 {strides = array<i32>} : memref<64x128xf32, #tpu.memory_space<vmem>>, vector<64x128xf32>,
    return
  }
  func.func @transform_0(%arg0: i32) -> (i32, i32) {
    %c0_i32 = arith.constant 0 : i32
    %c0_i32_0 = arith.constant 0 : i32
    return %arg0, %c0_i32 : i32, i32
  }
  func.func @transform_1(%arg0: i32) -> (i32, i32) {
    %c0_i32 = arith.constant 0 : i32
    %c0_i32_0 = arith.constant 0 : i32
    %c0_i32_1 = arith.constant 0 : i32
    return %c0_i32, %c0_i32_0 : i32, i32
  }
  func.func @transform_2(%arg0: i32) -> (i32, i32) {
    %c0_i32 = arith.constant 0 : i32
    %c0_i32_0 = arith.constant 0 : i32
    %c0_i32_1 = arith.constant 0 : i32
    return %c0_i32, %c0_i32_0 : i32, i32
  }
  func.func @transform_3(%arg0: i32) -> (i32, i32) {
    %c0_i32 = arith.constant 0 : i32
    %c0_i32_0 = arith.constant 0 : i32
    %c0_i32_1 = arith.constant 0 : i32
    return %c0_i32, %c0_i32_0 : i32, i32
  }
  func.func @transform_4(%arg0: i32) -> (i32, i32) {
    %c0_i32 = arith.constant 0 : i32
    %c0_i32_0 = arith.constant 0 : i32
    %c0_i32_1 = arith.constant 0 : i32
    return %c0_i32, %c0_i32_0 : i32, i32
  }
  func.func @transform_5(%arg0: i32) -> (i32, i32) {
    %c0_i32 = arith.constant 0 : i32
    %c0_i32_0 = arith.constant 0 : i32
    %c0_i32_1 = arith.constant 0 : i32
    return %c0_i32, %c0_i32_0 : i32, i32
  }
  func.func @transform_6(%arg0: i32) -> (i32, i32) {
    %c0_i32 = arith.constant 0 : i32
    %c0_i32_0 = arith.constant 0 : i32
    %c0_i32_1 = arith.constant 0 : i32
    return %c0_i32, %c0_i32_0 : i32, i32
  }
  func.func @transform_7(%arg0: i32) -> (i32, i32) {
    %c0_i32 = arith.constant 0 : i32
    %c0_i32_0 = arith.constant 0 : i32
    %c0_i32_1 = arith.constant 0 : i32
    return %c0_i32, %c0_i32_0 : i32, i32
  }
  func.func @transform_8(%arg0: i32) -> (i32, i32) {
    %c0_i32 = arith.constant 0 : i32
    %c0_i32_0 = arith.constant 0 : i32
    %c0_i32_1 = arith.constant 0 : i32
    return %c0_i32, %c0_i32_0 : i32, i32
  }
  func.func @transform_9(%arg0: i32) -> (i32, i32) {
    %c0_i32 = arith.constant 0 : i32
    %c0_i32_0 = arith.constant 0 : i32
    return %arg0, %c0_i32 : i32, i32
  }
  func.func @transform_10(%arg0: i32) -> (i32, i32) {
    %c0_i32 = arith.constant 0 : i32
    %c0_i32_0 = arith.constant 0 : i32
    return %arg0, %c0_i32 : i32, i32
  }
}

</mosaic_0001>

<bundles_post_ra>
// kernel: tpu_custom_call.1
= control target key start
LH: loop header
LB: loop body
LE: loop exit
PB: predicated region body
PF: predicated region fallthrough
CT: control target
= control target key end

     0   :  { %16 = vsyncpa [#allocation3], 0  ;;  %s1551_s0 = inlined_call_operand.hbm [shape: f32[64,128], index: 0, kind: input, shape index: {}]   ;;  %s1552_s1 = inlined_call_operand.hbm [shape: f32[128,128], index: 1, kind: input, shape index: {}]   ;;  %s1553_s2 = inlined_call_operand.vmem [shape: f32[1,128], index: 2, kind: input, shape index: {}]   ;;  %s1554_s3 = inlined_call_operand.hbm [shape: f32[128,128], index: 3, kind: input, shape index: {}]   ;;  %s1555_s4 = inlined_call_operand.vmem [shape: f32[1,128], index: 4, kind: input, shape index: {}]   ;;  %s1556_s5 = inlined_call_operand.hbm [shape: f32[128,128], index: 5, kind: input, shape index: {}]   ;;  %s1557_s6 = inlined_call_operand.vmem [shape: f32[1,128], index: 6, kind: input, shape index: {}]   ;;  %s1558_s7 = inlined_call_operand.hbm [shape: f32[128,128], index: 7, kind: input, shape index: {}]   ;;  %s1559_s8 = inlined_call_operand.vmem [shape: f32[1,128], index: 8, kind: input, shape index: {}]   ;;  %s1560_s9 = inlined_call_operand.hbm [shape: f32[64,128], index: 9, kind: output, shape index: {0}]   ;;  %s1561_s10 = inlined_call_operand.hbm [shape: f32[64,128], index: 10, kind: output, shape index: {1}]  }
   0x1   :  { %17 = vsyncpa [#allocation6], 0 }
   0x2   :  { %18 = vsyncpa [#allocation9], 0 }
   0x3   :  { %19 = vsyncpa [#allocation4], 0 }
   0x4   :  { %20 = vsyncpa [#allocation13], 0  ;;  %s1356_s13 = smov [#allocation5]   ;;  %s1357_s15 = smov [#allocation8]  }
   0x5   :  { %s38_s14 = sshll.u32 %s1356_s13, 4  ;;  %s66_s16 = sshll.u32 %s1357_s15, 4  ;;  %s39_s14 = int_to_ptr.vmem [resolvable:$true] %s38_s14  ;;  %s1420_s16 = int_to_ptr.vmem [resolvable:$true] %s66_s16 }
   0x6   :  { %s1192_s19 = scalar_lea.hbm %s1552_s1, 2048 }
   0x7   :  { %p1193_p0 = scmp.ne.s32.totalorder %s1552_s1, %s1192_s19  ;;  %p1196_p1 = scmp.lt.u32.totalorder %s1192_s19, %s1552_s1 }
   0x9   :  { %p1198_p2 = pnand %p1196_p1, %p1193_p0 }
   0xb   :  { %1201 = shalt.err (!%p1198_p2)
}
   0xc   :  { %s1202_s24 = scalar_lea.vmem %s39_s14, 2048  ;;  %p1207_p4 = scmp.lt.s32.totalorder %s39_s14, %s39_s14 }
   0xd   :  { %p1203_p3 = scmp.ne.s32.totalorder %s39_s14, %s1202_s24  ;;  %p1208_p5 = scmp.lt.s32.totalorder %s1202_s24, %s1202_s24 }
   0xf   :  { %p1209_p6 = por %p1208_p5, %p1207_p4 }
  0x11   :  { %p1210_p7 = pnand %p1209_p6, %p1203_p3 }
  0x13   :  { %1213 = shalt.err (!%p1210_p7)
}
  0x14   :  { %s1358_s25 = smov 128   ;;  %s1359_s26 = smov 8  }
  0x15   :  { %44 = dma.hbm_to_vmem [thread:$0]  %s1552_s1, 2048, %s39_s14, [#allocation6], %s1358_s25, %s1358_s25, %s1359_s26  }
  0x16   :  { %s1214_s11 = scalar_lea.hbm %s1556_s5, 2048 }
  0x17   :  { %p1215_p8 = scmp.ne.s32.totalorder %s1556_s5, %s1214_s11  ;;  %p1218_p9 = scmp.lt.u32.totalorder %s1214_s11, %s1556_s5 }
  0x19   :  { %p1220_p10 = pnand %p1218_p9, %p1215_p8 }
  0x1b   :  { %1223 = shalt.err (!%p1220_p10)
}
  0x1c   :  { %s1224_s18 = scalar_lea.vmem %s1420_s16, 2048  ;;  %p1229_p12 = scmp.lt.s32.totalorder %s1420_s16, %s1420_s16 }
  0x1d   :  { %p1225_p11 = scmp.ne.s32.totalorder %s1420_s16, %s1224_s18  ;;  %p1230_p13 = scmp.lt.s32.totalorder %s1224_s18, %s1224_s18 }
  0x1f   :  { %p1231_p0 = por %p1230_p13, %p1229_p12 }
  0x21   :  { %p1232_p1 = pnand %p1231_p0, %p1225_p11 }
  0x23   :  { %1235 = shalt.err (!%p1232_p1)
}
  0x24   :  { %72 = dma.hbm_to_vmem [thread:$0]  %s1556_s5, 2048, %s1420_s16, [#allocation9], %s1358_s25, %s1358_s25, %s1359_s26  }
  0x25   :  { %s1360_s19 = smov [#allocation2]   ;;  %s1361_s21 = smov [#allocation7]  }
  0x26   :  { %s26_s20 = sshll.u32 %s1360_s19, 4  ;;  %s52_s22 = sshll.u32 %s1361_s21, 4  ;;  %s27_s20 = int_to_ptr.vmem [resolvable:$true] %s26_s20  ;;  %s1457_s22 = int_to_ptr.vmem [resolvable:$true] %s52_s22 }
  0x27   :  { %s1236_s27 = scalar_lea.hbm %s1551_s0, 1024 }
  0x28   :  { %p1237_p2 = scmp.ne.s32.totalorder %s1551_s0, %s1236_s27  ;;  %p1240_p3 = scmp.lt.u32.totalorder %s1236_s27, %s1551_s0 }
  0x2a   :  { %p1242_p4 = pnand %p1240_p3, %p1237_p2 }
  0x2c   :  { %1245 = shalt.err (!%p1242_p4)
}
  0x2d   :  { %s1246_s5 = scalar_lea.vmem %s27_s20, 1024  ;;  %p1251_p6 = scmp.lt.s32.totalorder %s27_s20, %s27_s20 }
  0x2e   :  { %p1247_p5 = scmp.ne.s32.totalorder %s27_s20, %s1246_s5  ;;  %p1252_p7 = scmp.lt.s32.totalorder %s1246_s5, %s1246_s5 }
  0x30   :  { %p1253_p8 = por %p1252_p7, %p1251_p6 }
  0x32   :  { %p1254_p9 = pnand %p1253_p8, %p1247_p5 }
  0x34   :  { %1257 = shalt.err (!%p1254_p9)
}
  0x35   :  { %32 = dma.hbm_to_vmem [thread:$0]  %s1551_s0, 1024, %s27_s20, [#allocation3], %s1358_s25, %s1358_s25, %s1359_s26  }
  0x36   :  { %s1258_s17 = scalar_lea.hbm %s1554_s3, 2048 }
  0x37   :  { %p1259_p10 = scmp.ne.s32.totalorder %s1554_s3, %s1258_s17  ;;  %p1262_p11 = scmp.lt.u32.totalorder %s1258_s17, %s1554_s3 }
  0x39   :  { %p1264_p12 = pnand %p1262_p11, %p1259_p10 }
  0x3b   :  { %1267 = shalt.err (!%p1264_p12)
}
  0x3c   :  { %s1268_s21 = scalar_lea.vmem %s1457_s22, 2048  ;;  %p1273_p0 = scmp.lt.s32.totalorder %s1457_s22, %s1457_s22 }
  0x3d   :  { %p1269_p13 = scmp.ne.s32.totalorder %s1457_s22, %s1268_s21  ;;  %p1274_p1 = scmp.lt.s32.totalorder %s1268_s21, %s1268_s21 }
  0x3f   :  { %p1275_p2 = por %p1274_p1, %p1273_p0 }
  0x41   :  { %p1276_p3 = pnand %p1275_p2, %p1269_p13 }
  0x43   :  { %1279 = shalt.err (!%p1276_p3)
}
  0x44   :  { %58 = dma.hbm_to_vmem [thread:$0]  %s1554_s3, 2048, %s1457_s22, [#allocation6], %s1358_s25, %s1358_s25, %s1359_s26  }
  0x45   :  { %s1362_s23 = smov [#allocation10]   ;;  %s1280_s29 = scalar_lea.hbm %s1558_s7, 2048 }
  0x46   :  { %s80_s24 = sshll.u32 %s1362_s23, 4  ;;  %p1281_p4 = scmp.ne.s32.totalorder %s1558_s7, %s1280_s29  ;;  %s81_s24 = int_to_ptr.vmem [resolvable:$true] %s80_s24 }
  0x47   :  { %p1284_p5 = scmp.lt.u32.totalorder %s1280_s29, %s1558_s7 }
  0x49   :  { %p1286_p6 = pnand %p1284_p5, %p1281_p4 }
  0x4b   :  { %1289 = shalt.err (!%p1286_p6)
}
  0x4c   :  { %s1290_s12 = scalar_lea.vmem %s81_s24, 2048  ;;  %p1295_p8 = scmp.lt.s32.totalorder %s81_s24, %s81_s24 }
  0x4d   :  { %p1291_p7 = scmp.ne.s32.totalorder %s81_s24, %s1290_s12  ;;  %p1296_p9 = scmp.lt.s32.totalorder %s1290_s12, %s1290_s12 }
  0x4f   :  { %p1297_p10 = por %p1296_p9, %p1295_p8 }
  0x51   :  { %p1298_p11 = pnand %p1297_p10, %p1291_p7 }
  0x53   :  { %1301 = shalt.err (!%p1298_p11)
}
  0x54   :  { %86 = dma.hbm_to_vmem [thread:$0]  %s1558_s7, 2048, %s81_s24, [#allocation9], %s1358_s25, %s1358_s25, %s1359_s26  }
  0x55   :  { %1346 = dma.done.wait [#allocation3], 1024  }
  0x56   :  { %1347 = vsyncadd [#allocation3], 4294966272 }
  0x57   :  { %1348 = dma.done.wait [#allocation6], 4096  }
  0x58   :  { %1349 = vsyncadd [#allocation6], 4294963200 }
  0x59   :  { %1350 = dma.done.wait [#allocation9], 4096  }
  0x5a   :  { %1351 = vsyncadd [#allocation9], 4294963200  ;;  %v112_v0 = vld [vmem:[#allocation5] sm:$0xff]  ;;  %v113_v1 = vld [vmem:[#allocation5 + $0x8] sm:$0xff] }
  0x5b   :  { %v114_v2 = vld [vmem:[#allocation5 + $0x10] sm:$0xff]  ;;  %v1023_v3 = vpack.c.bf16 %v113_v1, %v112_v0  ;;  %v115_v4 = vld [vmem:[#allocation5 + $0x18] sm:$0xff]  ;;  %v116_v6 = vld [vmem:[#allocation5 + $0x20] sm:$0xff] }
  0x5c   :  { %v1027_v5 = vpack.c.bf16 %v115_v4, %v114_v2  ;;  %v117_v7 = vld [vmem:[#allocation5 + $0x28] sm:$0xff]  ;;  %v104_v9 = vld [vmem:[#allocation2] sm:$0xff]  ;;  %v118_v10 = vld [vmem:[#allocation5 + $0x30] sm:$0xff] }
  0x5d   :  { %1024 = vmatprep.subr.bf16.mxu0 %v1023_v3  ;;  %v1031_v8 = vpack.c.bf16 %v117_v7, %v116_v6  ;;  %v119_v11 = vld [vmem:[#allocation5 + $0x38] sm:$0xff]  ;;  %879 = vmatprep.mubr.f32.mxu0 %v104_v9  ;;  %v248_v12 = vld [vmem:[#allocation7] sm:$0xff]  ;;  %v249_v13 = vld [vmem:[#allocation7 + $0x8] sm:$0xff] }
  0x5e   :  { %1026 = vmatpush3.bf16.msra.mxu0 %v1023_v3  ;;  %v250_v14 = vld [vmem:[#allocation7 + $0x10] sm:$0xff]  ;;  %v1035_v15 = vpack.c.bf16 %v119_v11, %v118_v10  ;;  %v120_v16 = vld [vmem:[#allocation5 + $0x40] sm:$0xff]  ;;  %v1055_v17 = vpack.c.bf16 %v249_v13, %v248_v12  ;;  %v251_v18 = vld [vmem:[#allocation7 + $0x18] sm:$0xff] }
  0x5f   :  { %1028 = vmatprep.subr.bf16.mxu0 %v1027_v5  ;;  %v121_v19 = vld [vmem:[#allocation5 + $0x48] sm:$0xff]  ;;  %v1059_v20 = vpack.c.bf16 %v251_v18, %v250_v14  ;;  %v252_v21 = vld [vmem:[#allocation7 + $0x20] sm:$0xff]  ;;  %v122_v24 = vld [vmem:[#allocation5 + $0x50] sm:$0xff] }
  0x60   :  { %v253_v22 = vld [vmem:[#allocation7 + $0x28] sm:$0xff]  ;;  %1056 = vmatprep.subr.bf16.mxu1 %v1055_v17  ;;  %v1039_v23 = vpack.c.bf16 %v121_v19, %v120_v16  ;;  %v123_v26 = vld [vmem:[#allocation5 + $0x58] sm:$0xff]  ;;  %v254_v27 = vld [vmem:[#allocation7 + $0x30] sm:$0xff] }
  0x61   :  { %1058 = vmatpush3.bf16.msra.mxu1 %v1055_v17  ;;  %v1063_v25 = vpack.c.bf16 %v253_v22, %v252_v21  ;;  %v255_v28 = vld [vmem:[#allocation7 + $0x38] sm:$0xff]  ;;  %v1043_v29 = vpack.c.bf16 %v123_v26, %v122_v24  ;;  %v124_v30 = vld [vmem:[#allocation5 + $0x60] sm:$0xff]  ;;  %v125_v32 = vld [vmem:[#allocation5 + $0x68] sm:$0xff] }
  0x62   :  { %1030 = vmatpush3.bf16.msra.mxu0 %v1027_v5  ;;  %1060 = vmatprep.subr.bf16.mxu1 %v1059_v20  ;;  %v1067_v31 = vpack.c.bf16 %v255_v28, %v254_v27  ;;  %v256_v33 = vld [vmem:[#allocation7 + $0x40] sm:$0xff]  ;;  %v257_v34 = vld [vmem:[#allocation7 + $0x48] sm:$0xff]  ;;  %v1047_v35 = vpack.c.bf16 %v125_v32, %v124_v30  ;;  %v126_v36 = vld [vmem:[#allocation5 + $0x70] sm:$0xff] }
  0x63   :  { %1032 = vmatprep.subr.bf16.mxu0 %v1031_v8  ;;  %v1071_v37 = vpack.c.bf16 %v257_v34, %v256_v33  ;;  %v127_v38 = vld [vmem:[#allocation5 + $0x78] sm:$0xff]  ;;  %v258_v39 = vld [vmem:[#allocation7 + $0x50] sm:$0xff]  ;;  %v260_v43 = vld [vmem:[#allocation7 + $0x60] sm:$0xff] }
  0x64   :  { %v259_v40 = vld [vmem:[#allocation7 + $0x58] sm:$0xff]  ;;  %v1051_v41 = vpack.c.bf16 %v127_v38, %v126_v36  ;;  %v261_v44 = vld [vmem:[#allocation7 + $0x68] sm:$0xff]  ;;  %v106_v47 = vld [vmem:[#allocation2 + $0x10] sm:$0xff] }
  0x65   :  { %1062 = vmatpush3.bf16.msra.mxu1 %v1059_v20  ;;  %v1075_v42 = vpack.c.bf16 %v259_v40, %v258_v39  ;;  %v1079_v45 = vpack.c.bf16 %v261_v44, %v260_v43  ;;  %v105_v46 = vld [vmem:[#allocation2 + $0x8] sm:$0xff]  ;;  %v107_v48 = vld [vmem:[#allocation2 + $0x18] sm:$0xff]  ;;  %v108_v49 = vld [vmem:[#allocation2 + $0x20] sm:$0xff] }
  0x66   :  { %1034 = vmatpush3.bf16.msra.mxu0 %v1031_v8  ;;  %1064 = vmatprep.subr.bf16.mxu1 %v1063_v25  ;;  %v109_v50 = vld [vmem:[#allocation2 + $0x28] sm:$0xff]  ;;  %v110_v51 = vld [vmem:[#allocation2 + $0x30] sm:$0xff]  ;;  %v111_v52 = vld [vmem:[#allocation2 + $0x38] sm:$0xff] }
  0x67   :  { %1036 = vmatprep.subr.bf16.mxu0 %v1035_v15  ;;  %v262_v53 = vld [vmem:[#allocation7 + $0x70] sm:$0xff]  ;;  %v263_v54 = vld [vmem:[#allocation7 + $0x78] sm:$0xff]  ;;  %v424_v56 = vld [vmem:[#allocation8] sm:$0xff] }
  0x68   :  { %v1083_v55 = vpack.c.bf16 %v263_v54, %v262_v53  ;;  %v425_v57 = vld [vmem:[#allocation8 + $0x8] sm:$0xff]  ;;  %v739_v59 = vld [vmem:[%s1553_s2] ss:$0 sm:$0xff]  ;;  %v426_v20 = vld [vmem:[#allocation8 + $0x10] sm:$0xff] }
  0x69   :  { %1066 = vmatpush3.bf16.msra.mxu1 %v1063_v25  ;;  %v1087_v58 = vpack.c.bf16 %v425_v57, %v424_v56  ;;  %v427_v21 = vld [vmem:[#allocation8 + $0x18] sm:$0xff]  ;;  %v429_v24 = vld [vmem:[#allocation8 + $0x28] sm:$0xff]  ;;  %v430_v26 = vld [vmem:[#allocation8 + $0x30] sm:$0xff] }
  0x6a   :  { %1038 = vmatpush3.bf16.msra.mxu0 %v1035_v15  ;;  %1068 = vmatprep.subr.bf16.mxu1 %v1067_v31  ;;  %v1091_v22 = vpack.c.bf16 %v427_v21, %v426_v20  ;;  %v431_v27 = vld [vmem:[#allocation8 + $0x38] sm:$0xff]  ;;  %v433_v30 = vld [vmem:[#allocation8 + $0x48] sm:$0xff]  ;;  %v434_v32 = vld [vmem:[#allocation8 + $0x50] sm:$0xff] }
  0x6b   :  { %1040 = vmatprep.subr.bf16.mxu0 %v1039_v23  ;;  %v1099_v28 = vpack.c.bf16 %v431_v27, %v430_v26  ;;  %v435_v33 = vld [vmem:[#allocation8 + $0x58] sm:$0xff]  ;;  %v437_v36 = vld [vmem:[#allocation8 + $0x68] sm:$0xff]  ;;  %v438_v38 = vld [vmem:[#allocation8 + $0x70] sm:$0xff] }
  0x6c   :  { %v1107_v34 = vpack.c.bf16 %v435_v33, %v434_v32  ;;  %v439_v39 = vld [vmem:[#allocation8 + $0x78] sm:$0xff]  ;;  %v562_v43 = vld [vmem:[#allocation10 + $0x10] sm:$0xff]  ;;  %v568_v53 = vld [vmem:[#allocation10 + $0x40] sm:$0xff] }
  0x6d   :  { %1070 = vmatpush3.bf16.msra.mxu1 %v1067_v31  ;;  %v1115_v40 = vpack.c.bf16 %v439_v39, %v438_v38  ;;  %v569_v54 = vld [vmem:[#allocation10 + $0x48] sm:$0xff]  ;;  %v570_v56 = vld [vmem:[#allocation10 + $0x50] sm:$0xff]  ;;  %v571_v57 = vld [vmem:[#allocation10 + $0x58] sm:$0xff] }
  0x6e   :  { %1042 = vmatpush3.bf16.msra.mxu0 %v1039_v23  ;;  %1072 = vmatprep.subr.bf16.mxu1 %v1071_v37  ;;  %v428_v23 = vld [vmem:[#allocation8 + $0x20] sm:$0xff] }
  0x6f   :  { %1044 = vmatprep.subr.bf16.mxu0 %v1043_v29  ;;  %v1095_v25 = vpack.c.bf16 %v429_v24, %v428_v23 }
  0x71   :  { %1074 = vmatpush3.bf16.msra.mxu1 %v1071_v37 }
  0x72   :  { %1046 = vmatpush3.bf16.msra.mxu0 %v1043_v29  ;;  %1076 = vmatprep.subr.bf16.mxu1 %v1075_v42  ;;  %v432_v29 = vld [vmem:[#allocation8 + $0x40] sm:$0xff] }
  0x73   :  { %1048 = vmatprep.subr.bf16.mxu0 %v1047_v35  ;;  %v1103_v31 = vpack.c.bf16 %v433_v30, %v432_v29 }
  0x75   :  { %1078 = vmatpush3.bf16.msra.mxu1 %v1075_v42  ;;  %v561_v42 = vld [vmem:[#allocation10 + $0x8] sm:$0xff] }
  0x76   :  { %1050 = vmatpush3.bf16.msra.mxu0 %v1047_v35  ;;  %1080 = vmatprep.subr.bf16.mxu1 %v1079_v45  ;;  %v436_v35 = vld [vmem:[#allocation8 + $0x60] sm:$0xff] }
  0x77   :  { %1052 = vmatprep.subr.bf16.mxu0 %v1051_v41  ;;  %v1111_v37 = vpack.c.bf16 %v437_v36, %v436_v35 }
  0x79   :  { %1082 = vmatpush3.bf16.msra.mxu1 %v1079_v45  ;;  %v563_v45 = vld [vmem:[#allocation10 + $0x18] sm:$0xff] }
  0x7a   :  { %1054 = vmatpush3.bf16.msra.mxu0 %v1051_v41  ;;  %1084 = vmatprep.subr.bf16.mxu1 %v1083_v55  ;;  %v560_v41 = vld [vmem:[#allocation10] sm:$0xff] }
  0x7b   :  { %1088 = vmatprep.subr.bf16.mxu0 %v1087_v58  ;;  %v1119_v44 = vpack.c.bf16 %v561_v42, %v560_v41 }
  0x7d   :  { %880 = vmatmul.mubr.f32.vlgmr.msra.gmra.mrb[0].mxu0 %v105_v46  ;;  %1086 = vmatpush3.bf16.msra.mxu1 %v1083_v55  ;;  %v1123_v46 = vpack.c.bf16 %v563_v45, %v562_v43  ;;  %v1135_v55 = vpack.c.bf16 %v569_v54, %v568_v53 }
  0x7e   :  { %882 = vmatprep.mubr.f32.mxu0 %v106_v47  ;;  %1090 = vmatpush3.bf16.msra.mxu0 %v1087_v58  ;;  %v564_v47 = vld [vmem:[#allocation10 + $0x20] sm:$0xff]  ;;  %v1139_v58 = vpack.c.bf16 %v571_v57, %v570_v56 }
  0x7f   :  { %1092 = vmatprep.subr.bf16.mxu0 %v1091_v22  ;;  %1120 = vmatprep.subr.bf16.mxu1 %v1119_v44 }
  0x81   :  { %883 = vmatmul.mubr.f32.gmra.mrb[2].mxu0 %v107_v48  ;;  %v565_v48 = vld [vmem:[#allocation10 + $0x28] sm:$0xff] }
  0x82   :  { %885 = vmatprep.mubr.f32.mxu0 %v108_v49  ;;  %1094 = vmatpush3.bf16.msra.mxu0 %v1091_v22  ;;  %v1127_v49 = vpack.c.bf16 %v565_v48, %v564_v47  ;;  %v574_v47 = vld [vmem:[#allocation10 + $0x70] sm:$0xff]  ;;  %v575_v48 = vld [vmem:[#allocation10 + $0x78] sm:$0xff] }
  0x83   :  { %1096 = vmatprep.subr.bf16.mxu0 %v1095_v25 }
  0x85   :  { %886 = vmatmul.mubr.f32.gmra.mrb[4].mxu0 %v109_v50  ;;  %v566_v50 = vld [vmem:[#allocation10 + $0x30] sm:$0xff] }
  0x86   :  { %888 = vmatprep.mubr.f32.mxu0 %v110_v51  ;;  %1098 = vmatpush3.bf16.msra.mxu0 %v1095_v25  ;;  %v567_v51 = vld [vmem:[#allocation10 + $0x38] sm:$0xff] }
  0x87   :  { %1100 = vmatprep.subr.bf16.mxu0 %v1099_v28 }
  0x89   :  { %889 = vmatmul.mubr.f32.gmra.mrb[6].mxu0 %v111_v52  ;;  %v1131_v52 = vpack.c.bf16 %v567_v51, %v566_v50  ;;  %v749_v50 = vld [vmem:[%s1557_s6] ss:$0 sm:$0xff]  ;;  %s1363_s6 = smov [#allocation12]  }
  0x8a   :  { %1102 = vmatpush3.bf16.msra.mxu0 %v1099_v28  ;;  %s721_s18 = sshll.u32 %s1363_s6, 4  ;;  %s722_s18 = int_to_ptr.vmem [resolvable:$true] %s721_s18 }
  0x8b   :  { %1104 = vmatprep.subr.bf16.mxu0 %v1103_v31  ;;  %s1302_s1 = scalar_lea.vmem %s722_s18, 1024  ;;  %p1307_p13 = scmp.lt.s32.totalorder %s722_s18, %s722_s18 }
  0x8c   :  { %p1303_p12 = scmp.ne.s32.totalorder %s722_s18, %s1302_s1  ;;  %p1308_p0 = scmp.lt.s32.totalorder %s1302_s1, %s1302_s1 }
  0x8e   :  { %1106 = vmatpush3.bf16.msra.mxu0 %v1103_v31  ;;  %p1309_p1 = por %p1308_p0, %p1307_p13 }
  0x8f   :  { %1108 = vmatprep.subr.bf16.mxu0 %v1107_v34 }
  0x90   :  { %p1310_p2 = pnand %p1309_p1, %p1303_p12 }
  0x92   :  { %1110 = vmatpush3.bf16.msra.mxu0 %v1107_v34 }
  0x93   :  { %1112 = vmatprep.subr.bf16.mxu0 %v1111_v37 }
  0x96   :  { %1114 = vmatpush3.bf16.msra.mxu0 %v1111_v37 }
  0x97   :  { %1116 = vmatprep.subr.bf16.mxu0 %v1115_v40 }
  0x9a   :  { %1118 = vmatpush3.bf16.msra.mxu0 %v1115_v40 }
 0x150   :  { %v881_v60 = vpop.f32.mrb[0].mxu0 }
 0x151   :  { %v207_v61 = vadd.f32 %v881_v60, %v739_v59  ;;  %v201_v62 = vpop.f32.mrb[1].mxu0  ;;  %v573_v60 = vld [vmem:[#allocation10 + $0x68] sm:$0xff] }
 0x152   :  { %v202_v63 = vadd.f32 %v739_v59, %v201_v62  ;;  %v740_v62 = vld [vmem:[%s1555_s4] ss:$0 sm:$0xff] }
 0x153   :  { %v241_v2 = vmax.f32 %v207_v61, 0.0 }
 0x154   :  { %v884_v0 = vpop.f32.mrb[2].mxu0  ;;  %v240_v1 = vmax.f32 %v202_v63, 0.0 }
 0x155   :  { %v217_v3 = vadd.f32 %v884_v0, %v739_v59  ;;  %v211_v4 = vpop.f32.mrb[3].mxu0 }
 0x156   :  { %v212_v5 = vadd.f32 %v739_v59, %v211_v4  ;;  %923 = vmatprep.mubr.f32.mxu1 %v240_v1 }
 0x157   :  { %924 = vmatmul.mubr.f32.vlgmr.msra.gmra.mrb[0].mxu1 %v241_v2  ;;  %v243_v8 = vmax.f32 %v217_v3, 0.0 }
 0x158   :  { %v242_v6 = vmax.f32 %v212_v5, 0.0  ;;  %v887_v7 = vpop.f32.mrb[4].mxu0  ;;  %1122 = vmatpush3.bf16.msra.mxu1 %v1119_v44 }
 0x159   :  { %v227_v9 = vadd.f32 %v887_v7, %v739_v59  ;;  %v221_v10 = vpop.f32.mrb[5].mxu0  ;;  %1124 = vmatprep.subr.bf16.mxu1 %v1123_v46 }
 0x15a   :  { %v222_v11 = vadd.f32 %v739_v59, %v221_v10  ;;  %926 = vmatprep.mubr.f32.mxu1 %v242_v6 }
 0x15b   :  { %927 = vmatmul.mubr.f32.gmra.mrb[2].mxu1 %v243_v8  ;;  %v245_v14 = vmax.f32 %v227_v9, 0.0 }
 0x15c   :  { %v244_v12 = vmax.f32 %v222_v11, 0.0  ;;  %v890_v13 = vpop.f32.mrb[6].mxu0  ;;  %1126 = vmatpush3.bf16.msra.mxu1 %v1123_v46 }
 0x15d   :  { %v237_v15 = vadd.f32 %v890_v13, %v739_v59  ;;  %v231_v16 = vpop.f32.mrb[7].mxu0  ;;  %1128 = vmatprep.subr.bf16.mxu1 %v1127_v49 }
 0x15e   :  { %v232_v17 = vadd.f32 %v739_v59, %v231_v16  ;;  %929 = vmatprep.mubr.f32.mxu1 %v244_v12  ;;  %v572_v59 = vld [vmem:[#allocation10 + $0x60] sm:$0xff] }
 0x15f   :  { %930 = vmatmul.mubr.f32.gmra.mrb[4].mxu1 %v245_v14  ;;  %v247_v19 = vmax.f32 %v237_v15, 0.0  ;;  %v1143_v61 = vpack.c.bf16 %v573_v60, %v572_v59 }
 0x160   :  { %v246_v18 = vmax.f32 %v232_v17, 0.0  ;;  %1130 = vmatpush3.bf16.msra.mxu1 %v1127_v49  ;;  %v1147_v49 = vpack.c.bf16 %v575_v48, %v574_v47 }
 0x161   :  { %1132 = vmatprep.subr.bf16.mxu1 %v1131_v52 }
 0x162   :  { %932 = vmatprep.mubr.f32.mxu1 %v246_v18 }
 0x163   :  { %933 = vmatmul.mubr.f32.gmra.mrb[6].mxu1 %v247_v19 }
 0x164   :  { %1134 = vmatpush3.bf16.msra.mxu1 %v1131_v52 }
 0x165   :  { %1136 = vmatprep.subr.bf16.mxu1 %v1135_v55 }
 0x168   :  { %1138 = vmatpush3.bf16.msra.mxu1 %v1135_v55 }
 0x169   :  { %1140 = vmatprep.subr.bf16.mxu1 %v1139_v58 }
 0x16c   :  { %1142 = vmatpush3.bf16.msra.mxu1 %v1139_v58 }
 0x16d   :  { %1144 = vmatprep.subr.bf16.mxu1 %v1143_v61 }
 0x170   :  { %1146 = vmatpush3.bf16.msra.mxu1 %v1143_v61 }
 0x171   :  { %1148 = vmatprep.subr.bf16.mxu1 %v1147_v49 }
 0x174   :  { %1150 = vmatpush3.bf16.msra.mxu1 %v1147_v49 }
 0x22a   :  { %v925_v63 = vpop.f32.mrb[0].mxu1 }
 0x22b   :  { %v343_v0 = vadd.f32 %v925_v63, %v740_v62  ;;  %v337_v1 = vpop.f32.mrb[1].mxu1 }
 0x22c   :  { %v338_v2 = vadd.f32 %v740_v62, %v337_v1 }
 0x22d   :  { %v742_v3 = vmul.f32 -1.442695, %v343_v0 }
 0x22e   :  { %v741_v4 = vmul.f32 -1.442695, %v338_v2  ;;  %v928_v5 = vpop.f32.mrb[2].mxu1 }
 0x22f   :  { %1160 = vpow2.f32 %v742_v3  ;;  %v353_v6 = vadd.f32 %v928_v5, %v740_v62  ;;  %v347_v7 = vpop.f32.mrb[3].mxu1 }
 0x230   :  { %1162 = vpow2.f32 %v741_v4  ;;  %v348_v8 = vadd.f32 %v740_v62, %v347_v7 }
 0x231   :  { %v744_v9 = vmul.f32 -1.442695, %v353_v6 }
 0x232   :  { %v743_v10 = vmul.f32 -1.442695, %v348_v8  ;;  %v931_v11 = vpop.f32.mrb[4].mxu1 }
 0x233   :  { %1164 = vpow2.f32 %v744_v9  ;;  %v363_v12 = vadd.f32 %v931_v11, %v740_v62  ;;  %v357_v13 = vpop.f32.mrb[5].mxu1 }
 0x234   :  { %1166 = vpow2.f32 %v743_v10  ;;  %v358_v14 = vadd.f32 %v740_v62, %v357_v13 }
 0x235   :  { %v746_v15 = vmul.f32 -1.442695, %v363_v12 }
 0x236   :  { %v745_v16 = vmul.f32 -1.442695, %v358_v14  ;;  %v934_v17 = vpop.f32.mrb[6].mxu1 }
 0x237   :  { %1168 = vpow2.f32 %v746_v15  ;;  %v373_v18 = vadd.f32 %v934_v17, %v740_v62  ;;  %v367_v19 = vpop.f32.mrb[7].mxu1 }
 0x238   :  { %1170 = vpow2.f32 %v745_v16  ;;  %v368_v20 = vadd.f32 %v740_v62, %v367_v19 }
 0x239   :  { %v1161_v21 = vpop.eup %1160  ;;  %v748_v22 = vmul.f32 -1.442695, %v373_v18 }
 0x23a   :  { %v1163_v23 = vpop.eup %1162  ;;  %v401_v24 = vadd.f32 1.0, %v1161_v21  ;;  %v747_v25 = vmul.f32 -1.442695, %v368_v20 }
 0x23b   :  { %v400_v26 = vadd.f32 1.0, %v1163_v23  ;;  %1172 = vpow2.f32 %v748_v22 }
 0x23c   :  { %1174 = vrcp.f32 %v401_v24 }
 0x23d   :  { %v1165_v27 = vpop.eup %1164  ;;  %1176 = vrcp.f32 %v400_v26 }
 0x23e   :  { %v1167_v28 = vpop.eup %1166  ;;  %v403_v29 = vadd.f32 1.0, %v1165_v27  ;;  %1178 = vpow2.f32 %v747_v25 }
 0x23f   :  { %v402_v30 = vadd.f32 1.0, %v1167_v28 }
 0x240   :  { %1180 = vrcp.f32 %v403_v29 }
 0x241   :  { %v1169_v31 = vpop.eup %1168  ;;  %1182 = vrcp.f32 %v402_v30 }
 0x242   :  { %v1171_v32 = vpop.eup %1170  ;;  %v405_v33 = vadd.f32 1.0, %v1169_v31 }
 0x243   :  { %v404_v34 = vadd.f32 1.0, %v1171_v32 }
 0x244   :  { %1184 = vrcp.f32 %v405_v33 }
 0x245   :  { %v1173_v35 = vpop.eup %1172  ;;  %1186 = vrcp.f32 %v404_v34 }
 0x246   :  { %v1175_v36 = vpop.eup %1174  ;;  %v407_v37 = vadd.f32 1.0, %v1173_v35 }
 0x247   :  { %v1177_v38 = vpop.eup %1176  ;;  %689 = vst [vmem:[#allocation12 + $0x8] sm:$0xff] %v1175_v36 }
 0x248   :  { %v1179_v39 = vpop.eup %1178  ;;  %688 = vst [vmem:[#allocation12] sm:$0xff] %v1177_v38  ;;  %1188 = vrcp.f32 %v407_v37  ;;  %967 = vmatprep.mubr.f32.mxu0 %v1177_v38 }
 0x249   :  { %v406_v40 = vadd.f32 1.0, %v1179_v39  ;;  %968 = vmatmul.mubr.f32.vlgmr.msra.gmra.mrb[8].mxu0 %v1175_v36 }
 0x24a   :  { %v1181_v41 = vpop.eup %1180 }
 0x24b   :  { %v1183_v42 = vpop.eup %1182  ;;  %691 = vst [vmem:[#allocation12 + $0x18] sm:$0xff] %v1181_v41  ;;  %1190 = vrcp.f32 %v406_v40 }
 0x24c   :  { %690 = vst [vmem:[#allocation12 + $0x10] sm:$0xff] %v1183_v42  ;;  %970 = vmatprep.mubr.f32.mxu0 %v1183_v42 }
 0x24d   :  { %971 = vmatmul.mubr.f32.gmra.mrb[10].mxu0 %v1181_v41 }
 0x24e   :  { %v1185_v43 = vpop.eup %1184 }
 0x24f   :  { %v1187_v44 = vpop.eup %1186  ;;  %693 = vst [vmem:[#allocation12 + $0x28] sm:$0xff] %v1185_v43 }
 0x250   :  { %692 = vst [vmem:[#allocation12 + $0x20] sm:$0xff] %v1187_v44  ;;  %973 = vmatprep.mubr.f32.mxu0 %v1187_v44 }
 0x251   :  { %974 = vmatmul.mubr.f32.gmra.mrb[12].mxu0 %v1185_v43 }
 0x252   :  { %v1189_v45 = vpop.eup %1188 }
 0x253   :  { %695 = vst [vmem:[#allocation12 + $0x38] sm:$0xff] %v1189_v45 }
 0x255   :  { %v1191_v46 = vpop.eup %1190 }
 0x256   :  { %694 = vst [vmem:[#allocation12 + $0x30] sm:$0xff] %v1191_v46  ;;  %976 = vmatprep.mubr.f32.mxu0 %v1191_v46 }
 0x257   :  { %977 = vmatmul.mubr.f32.gmra.mrb[14].mxu0 %v1189_v45 }
 0x31c   :  { %v969_v51 = vpop.f32.mrb[8].mxu0 }
 0x31d   :  { %v519_v52 = vadd.f32 %v969_v51, %v749_v50  ;;  %v513_v53 = vpop.f32.mrb[9].mxu0 }
 0x31e   :  { %v514_v54 = vadd.f32 %v749_v50, %v513_v53 }
 0x31f   :  { %v553_v57 = vmax.f32 %v519_v52, 0.0 }
 0x320   :  { %v552_v55 = vmax.f32 %v514_v54, 0.0  ;;  %v972_v56 = vpop.f32.mrb[10].mxu0 }
 0x321   :  { %v529_v58 = vadd.f32 %v972_v56, %v749_v50  ;;  %v523_v59 = vpop.f32.mrb[11].mxu0 }
 0x322   :  { %v524_v60 = vadd.f32 %v749_v50, %v523_v59  ;;  %1011 = vmatprep.mubr.f32.mxu1 %v552_v55 }
 0x323   :  { %1012 = vmatmul.mubr.f32.vlgmr.msra.gmra.mrb[8].mxu1 %v553_v57  ;;  %v555_v63 = vmax.f32 %v529_v58, 0.0 }
 0x324   :  { %v554_v61 = vmax.f32 %v524_v60, 0.0  ;;  %v975_v62 = vpop.f32.mrb[12].mxu0 }
 0x325   :  { %v539_v0 = vadd.f32 %v975_v62, %v749_v50  ;;  %v533_v1 = vpop.f32.mrb[13].mxu0 }
 0x326   :  { %v534_v2 = vadd.f32 %v749_v50, %v533_v1  ;;  %1014 = vmatprep.mubr.f32.mxu1 %v554_v61 }
 0x327   :  { %1015 = vmatmul.mubr.f32.gmra.mrb[10].mxu1 %v555_v63  ;;  %v557_v4 = vmax.f32 %v539_v0, 0.0 }
 0x328   :  { %v556_v3 = vmax.f32 %v534_v2, 0.0 }
 0x32a   :  { %v978_v5 = vpop.f32.mrb[14].mxu0  ;;  %1017 = vmatprep.mubr.f32.mxu1 %v556_v3 }
 0x32b   :  { %v549_v6 = vadd.f32 %v978_v5, %v749_v50  ;;  %v543_v7 = vpop.f32.mrb[15].mxu0  ;;  %1018 = vmatmul.mubr.f32.gmra.mrb[12].mxu1 %v557_v4 }
 0x32c   :  { %v544_v8 = vadd.f32 %v749_v50, %v543_v7 }
 0x32d   :  { %v559_v10 = vmax.f32 %v549_v6, 0.0 }
 0x32e   :  { %v558_v9 = vmax.f32 %v544_v8, 0.0 }
 0x330   :  { %1020 = vmatprep.mubr.f32.mxu1 %v558_v9 }
 0x331   :  { %1021 = vmatmul.mubr.f32.gmra.mrb[14].mxu1 %v559_v10 }
 0x332   :  { %1313 = shalt.err (!%p1310_p2)
}
 0x333   :  { %s1314_s21 = scalar_lea.hbm %s1561_s10, 1024 }
 0x334   :  { %p1315_p3 = scmp.ne.s32.totalorder %s1561_s10, %s1314_s21  ;;  %p1318_p4 = scmp.lt.u32.totalorder %s1314_s21, %s1561_s10 }
 0x336   :  { %p1320_p5 = pnand %p1318_p4, %p1315_p3 }
 0x338   :  { %1323 = shalt.err (!%p1320_p5)
}
 0x339   :  { %727 = dma.vmem_to_hbm [thread:$0]  %s722_s18, 1024, %s1561_s10, [#allocation13], %s1358_s25, %s1358_s25, %s1359_s26  }
 0x33a   :  { %v750_v11 = vld [vmem:[%s1559_s8] ss:$0 sm:$0xff]  ;;  %s1364_s10 = smov [#allocation11]  }
 0x33b   :  { %s709_s8 = sshll.u32 %s1364_s10, 4  ;;  %s710_s8 = int_to_ptr.vmem [resolvable:$true] %s709_s8 }
 0x33c   :  { %s1324_s11 = scalar_lea.vmem %s710_s8, 1024  ;;  %p1329_p7 = scmp.lt.s32.totalorder %s710_s8, %s710_s8 }
 0x33d   :  { %p1325_p6 = scmp.ne.s32.totalorder %s710_s8, %s1324_s11  ;;  %p1330_p8 = scmp.lt.s32.totalorder %s1324_s11, %s1324_s11 }
 0x33f   :  { %p1331_p9 = por %p1330_p8, %p1329_p7 }
 0x341   :  { %p1332_p10 = pnand %p1331_p9, %p1325_p6 }
 0x3f6   :  { %v1013_v12 = vpop.f32.mrb[8].mxu1 }
 0x3f7   :  { %v655_v13 = vadd.f32 %v1013_v12, %v750_v11  ;;  %v649_v14 = vpop.f32.mrb[9].mxu1 }
 0x3f8   :  { %v650_v15 = vadd.f32 %v750_v11, %v649_v14 }
 0x3f9   :  { %697 = vst [vmem:[#allocation11 + $0x8] sm:$0xff] %v655_v13 }
 0x3fa   :  { %696 = vst [vmem:[#allocation11] sm:$0xff] %v650_v15  ;;  %v1016_v16 = vpop.f32.mrb[10].mxu1 }
 0x3fb   :  { %v665_v17 = vadd.f32 %v1016_v16, %v750_v11  ;;  %v659_v18 = vpop.f32.mrb[11].mxu1 }
 0x3fc   :  { %v660_v19 = vadd.f32 %v750_v11, %v659_v18 }
 0x3fd   :  { %699 = vst [vmem:[#allocation11 + $0x18] sm:$0xff] %v665_v17 }
 0x3fe   :  { %698 = vst [vmem:[#allocation11 + $0x10] sm:$0xff] %v660_v19  ;;  %v1019_v20 = vpop.f32.mrb[12].mxu1 }
 0x3ff   :  { %v675_v21 = vadd.f32 %v1019_v20, %v750_v11  ;;  %v669_v22 = vpop.f32.mrb[13].mxu1 }
 0x400   :  { %v670_v23 = vadd.f32 %v750_v11, %v669_v22 }
 0x401   :  { %701 = vst [vmem:[#allocation11 + $0x28] sm:$0xff] %v675_v21 }
 0x402   :  { %700 = vst [vmem:[#allocation11 + $0x20] sm:$0xff] %v670_v23 }
 0x404   :  { %v1022_v24 = vpop.f32.mrb[14].mxu1 }
 0x405   :  { %v685_v25 = vadd.f32 %v1022_v24, %v750_v11  ;;  %v679_v26 = vpop.f32.mrb[15].mxu1 }
 0x406   :  { %v680_v27 = vadd.f32 %v750_v11, %v679_v26 }
 0x407   :  { %703 = vst [vmem:[#allocation11 + $0x38] sm:$0xff] %v685_v25 }
 0x408   :  { %702 = vst [vmem:[#allocation11 + $0x30] sm:$0xff] %v680_v27 }
 0x409   :  { %1335 = shalt.err (!%p1332_p10)
}
 0x40a   :  { %s1336_s12 = scalar_lea.hbm %s1560_s9, 1024 }
 0x40b   :  { %p1337_p11 = scmp.ne.s32.totalorder %s1560_s9, %s1336_s12  ;;  %p1340_p12 = scmp.lt.u32.totalorder %s1336_s12, %s1560_s9 }
 0x40d   :  { %p1342_p13 = pnand %p1340_p12, %p1337_p11 }
 0x40f   :  { %1345 = shalt.err (!%p1342_p13)
}
 0x410   :  { %715 = dma.vmem_to_hbm [thread:$0]  %s710_s8, 1024, %s1560_s9, [#allocation4], %s1358_s25, %s1358_s25, %s1359_s26  }
 0x411   :  { %1352 = dma.done.wait [#allocation4], 1024  }
 0x412   :  { %1353 = vsyncadd [#allocation4], 4294966272 }
 0x413   :  { %1354 = dma.done.wait [#allocation13], 1024  }
 0x414   :  { %1355 = vsyncadd [#allocation13], 4294966272 }
 0x415   :  { %734 = vsyncpa [#allocation3], 1 }
 0x416   :  { %735 = vsyncpa [#allocation6], 1 }
 0x417   :  { %736 = vsyncpa [#allocation9], 1 }
 0x418   :  { %737 = vsyncpa [#allocation4], 1 }
 0x419   :  { %738 = vsyncpa [#allocation13], 1 }

</bundles_post_ra>
